<compile_context>
chip_gen: v7x
topology: tpu7x:2x2x1
jax: 0.10.0
libtpu: 0.0.40
codegen_flags: <defaults>
</compile_context>

<pallas_src>
import functools

import jax
import jax.numpy as jnp
from jax.experimental import pallas as pl
from jax.experimental.pallas import tpu as pltpu


def _remap_label_kernel(lab_ref, out_ref, *, ngpus, sub_sz):
    """Gridless single invocation.

    lab_ref: (8, num_p) f32        -- label fields channel-major, boxes on
                                      lanes; row 0 = per-box batch index,
                                      rows 1..7 = untouched annotations.
    out_ref: (ngpus, 8, num_p) f32 -- per-shard remapped label, same layout.
    """
    lab = lab_ref[...]                                           # (8, num_p)
    # Row-0 selector, hoisted out of the shard loop (computed once).
    is_idx_row = jax.lax.broadcasted_iota(jnp.int32, lab.shape, 0) == 0

    for i in range(ngpus):              # static unroll, compile-time lo / hi
        lo = jnp.float32(i * sub_sz)
        hi = jnp.float32((i + 1) * sub_sz)
        # Mirror the PyTorch in-place sequence on column 0, fused into one
        # select:  sub[sub > hi] = -1 ; sub[sub < lo] = -1 ; sub = sub - lo
        # (the -1 sentinels also get shifted by -lo, exactly as in PyTorch).
        remapped = jnp.where((lab > hi) | (lab < lo),
                             jnp.float32(-1.0), lab) - lo
        # Row 0 gets the remapped index, rows 1..7 pass through; one full,
        # unmasked, lane-dense (8, num_p) store per shard.
        out_ref[i] = jnp.where(is_idx_row, remapped, lab)


def convert2batch(label, batch_size, ngpus):
    """Pallas equivalent of ParallelCaffeNet.convert2batch.

    label: (1, 1, num, 8) f32.
    Returns (ngpus, 1, num, 8) when ngpus > 1, otherwise `label` unchanged.
    """
    if ngpus <= 1:
        return label

    num = int(label.shape[2])
    # True (float) division, matching the Python-3 PyTorch source; a
    # batch_size not divisible by ngpus yields fractional shard bounds.
    sub_sz = batch_size / ngpus

    # Channel-major, lane-dense presentation: (8, num) with boxes on lanes.
    lab_t = jnp.swapaxes(label[0, 0], 0, 1)                       # (8, num)

    # Pad num up to a multiple of 128 so all kernel stores are unmasked vst.
    num_p = ((num + 127) // 128) * 128
    if num_p != num:
        lab_t = jnp.pad(lab_t, ((0, 0), (0, num_p - num)))

    out = pl.pallas_call(
        functools.partial(_remap_label_kernel, ngpus=ngpus,
                          sub_sz=float(sub_sz)),
        out_shape=jax.ShapeDtypeStruct((ngpus, 8, num_p), label.dtype),
        in_specs=[pl.BlockSpec(memory_space=pltpu.MemorySpace.VMEM)],
        out_specs=pl.BlockSpec(memory_space=pltpu.MemorySpace.VMEM),
    )(lab_t)                                               # (ngpus, 8, num_p)

    # Back to the module's (ngpus, 1, num, 8) layout (one plain transpose; the
    # kernel already produced the full slab, so no broadcast / scatter here).
    # TODO(synk): if the downstream SSD net accepts channel-major labels,
    # return `out[:, :, :num]` directly and skip this transpose.
    return jnp.swapaxes(out[:, :, :num], 1, 2)[:, None, :, :]


def parallel_caffenet_forward(data, label, device_ids):
    """Mirrors ParallelCaffeNet.forward:
       - derive batch_size from data.size(0)
       - re-batch the label per device with convert2batch (Pallas kernel)
       - run the wrapped net on (data, label).
    """
    batch_size = data.shape[0]
    ngpus = len(device_ids)
    label_batched = convert2batch(label, batch_size, ngpus)
    # TODO(synk): the wrapped `caffe_module` (SSD net run under
    # nn.DataParallel) is an external, undefined module — no defined forward
    # to port here.
    return data, label_batched


if __name__ == "__main__":
    key = jax.random.PRNGKey(0)
    k_data, k_idx, k_rest = jax.random.split(key, 3)

    # Small shapes consistent with the module's forward:
    batch, C, H, W = 4, 3, 16, 16          # `data` from the caffe data layer
    device_ids = (0, 1)                    # 2 synthetic "GPUs" -> 2 shards
    ngpus = len(device_ids)

    data = jax.random.normal(k_data, (batch, C, H, W), dtype=jnp.float32)

    def make_label(num):
        # label: (1, 1, num, 8); column 0 = batch index of each box.
        box_idx = jax.random.randint(k_idx, (num,), 0, batch).astype(jnp.float32)
        rest = jax.random.uniform(k_rest, (num, 7), dtype=jnp.float32)
        lab = jnp.concatenate([box_idx[:, None], rest], axis=1)
        return lab.reshape(1, 1, num, 8)

    def reference(label, num):
        # Plain-JAX reference mirroring the PyTorch in-place view semantics.
        sub_sz = batch / ngpus
        ref = jnp.broadcast_to(label, (ngpus, 1, num, 8))
        cols = []
        for i in range(ngpus):
            v = ref[i, 0, :, 0]
            v = jnp.where(v > (i + 1) * sub_sz, -1.0, v)
            v = jnp.where(v < i * sub_sz, -1.0, v)
            cols.append(v - sub_sz * i)
        return ref.at[:, 0, :, 0].set(jnp.stack(cols))

    # num = 128 (lane-aligned) and num = 40 (exercises the padding path).
    for num in (128, 40):
        label = make_label(num)
        out_data, out_label = parallel_caffenet_forward(data, label, device_ids)
        out_label = jax.block_until_ready(out_label)
        assert out_label.shape == (ngpus, 1, num, 8)
        ref = reference(label, num)
        assert jnp.allclose(out_label, ref, atol=1e-6), \
            f"mismatch vs reference (num={num})"

    print("KERNEL_OK")
</pallas_src>

<mosaic_0001>
module attributes {stable_mosaic.version = 11 : i64} {
  func.func @_remap_label_kernel(%arg0: memref<8x128xf32, #tpu.memory_space<vmem>>, %arg1: memref<2x8x128xf32, #tpu.memory_space<vmem>>) attributes {dimension_semantics = [], scalar_prefetch = 0 : i64, scratch_operands = 0 : i64, tpu.core_type = #tpu.core_type<tc>} {
    %c0 = arith.constant 0 : index
    %c0_0 = arith.constant 0 : index
    %0 = vector.load %arg0[%c0, %c0_0] : memref<8x128xf32, #tpu.memory_space<vmem>>, vector<8x128xf32>
    %1 = tpu.iota {dimensions = array<i32: 0>} : vector<8x128xi32>
    %c0_i32 = arith.constant 0 : i32
    %2 = vector.broadcast %c0_i32 : i32 to vector<8x128xi32>
    %3 = arith.cmpi eq, %1, %2 : vector<8x128xi32>
    %cst = arith.constant 2.000000e+00 : f32
    %4 = vector.broadcast %cst : f32 to vector<8x128xf32>
    %5 = arith.cmpf ogt, %0, %4 : vector<8x128xf32>
    %cst_1 = arith.constant 0.000000e+00 : f32
    %6 = vector.broadcast %cst_1 : f32 to vector<8x128xf32>
    %7 = arith.cmpf olt, %0, %6 : vector<8x128xf32>
    %8 = arith.ori %5, %7 : vector<8x128xi1>
    %cst_2 = arith.constant -1.000000e+00 : f32
    %9 = vector.broadcast %cst_2 : f32 to vector<8x128xf32>
    %10 = arith.select %8, %9, %0 : vector<8x128xi1>, vector<8x128xf32>
    %cst_3 = arith.constant 0.000000e+00 : f32
    %11 = vector.broadcast %cst_3 : f32 to vector<8x128xf32>
    %12 = arith.subf %10, %11 : vector<8x128xf32>
    %13 = arith.select %3, %12, %0 : vector<8x128xi1>, vector<8x128xf32>
    %c0_4 = arith.constant 0 : index
    %c0_5 = arith.constant 0 : index
    %c0_6 = arith.constant 0 : index
    %14 = vector.load %arg1[%c0_4, %c0_5, %c0_6] : memref<2x8x128xf32, #tpu.memory_space<vmem>>, vector<1x8x128xf32>
    %15 = vector.shape_cast %14 : vector<1x8x128xf32> to vector<8x128xf32>
    %16 = vector.shape_cast %13 : vector<8x128xf32> to vector<1x8x128xf32>
    tpu.vector_store %arg1[%c0_4, %c0_5, %c0_6], %16 {strides = array<i32>} : memref<2x8x128xf32, #tpu.memory_space<vmem>>, vector<1x8x128xf32>,
    %cst_7 = arith.constant 4.000000e+00 : f32
    %17 = vector.broadcast %cst_7 : f32 to vector<8x128xf32>
    %18 = arith.cmpf ogt, %0, %17 : vector<8x128xf32>
    %cst_8 = arith.constant 2.000000e+00 : f32
    %19 = vector.broadcast %cst_8 : f32 to vector<8x128xf32>
    %20 = arith.cmpf olt, %0, %19 : vector<8x128xf32>
    %21 = arith.ori %18, %20 : vector<8x128xi1>
    %cst_9 = arith.constant -1.000000e+00 : f32
    %22 = vector.broadcast %cst_9 : f32 to vector<8x128xf32>
    %23 = arith.select %21, %22, %0 : vector<8x128xi1>, vector<8x128xf32>
    %cst_10 = arith.constant 2.000000e+00 : f32
    %24 = vector.broadcast %cst_10 : f32 to vector<8x128xf32>
    %25 = arith.subf %23, %24 : vector<8x128xf32>
    %26 = arith.select %3, %25, %0 : vector<8x128xi1>, vector<8x128xf32>
    %c1 = arith.constant 1 : index
    %c0_11 = arith.constant 0 : index
    %c0_12 = arith.constant 0 : index
    %27 = vector.load %arg1[%c1, %c0_11, %c0_12] : memref<2x8x128xf32, #tpu.memory_space<vmem>>, vector<1x8x128xf32>
    %28 = vector.shape_cast %27 : vector<1x8x128xf32> to vector<8x128xf32>
    %29 = vector.shape_cast %26 : vector<8x128xf32> to vector<1x8x128xf32>
    tpu.vector_store %arg1[%c1, %c0_11, %c0_12], %29 {strides = array<i32>} : memref<2x8x128xf32, #tpu.memory_space<vmem>>, vector<1x8x128xf32>,
    return
  }
}

</mosaic_0001>

<bundles_post_ra>
// kernel: tpu_custom_call.1
= control target key start
LH: loop header
LB: loop body
LE: loop exit
PB: predicated region body
PF: predicated region fallthrough
CT: control target
= control target key end

     0   :  { %6 = vsyncpa [#allocation3], 0  ;;  %s147_s0 = inlined_call_operand.hbm [shape: f32[8,128], index: 0, kind: input, shape index: {}]   ;;  %s148_s1 = inlined_call_operand.hbm [shape: f32[2,8,128], index: 1, kind: output, shape index: {}]  }
   0x1   :  { %7 = vsyncpa [#allocation4], 0  ;;  %s109_s6 = smov [#allocation2]   ;;  %s61_s10 = scalar_lea.hbm %s147_s0, 128 }
   0x2   :  { %s14_s7 = sshll.u32 %s109_s6, 4  ;;  %p62_p0 = scmp.ne.s32.totalorder %s147_s0, %s61_s10  ;;  %s15_s7 = int_to_ptr.vmem [resolvable:$true] %s14_s7 }
   0x3   :  { %p65_p1 = scmp.lt.u32.totalorder %s61_s10, %s147_s0 }
   0x5   :  { %p67_p2 = pnand %p65_p1, %p62_p0 }
   0x7   :  { %70 = shalt.err (!%p67_p2)
}
   0x8   :  { %s71_s15 = scalar_lea.vmem %s15_s7, 128  ;;  %p76_p4 = scmp.lt.s32.totalorder %s15_s7, %s15_s7 }
   0x9   :  { %p72_p3 = scmp.ne.s32.totalorder %s15_s7, %s71_s15  ;;  %p77_p5 = scmp.lt.s32.totalorder %s71_s15, %s71_s15 }
   0xb   :  { %p78_p6 = por %p77_p5, %p76_p4 }
   0xd   :  { %p79_p7 = pnand %p78_p6, %p72_p3 }
   0xf   :  { %82 = shalt.err (!%p79_p7)
}
  0x10   :  { %17 = dma.hbm_to_vmem [thread:$0]  %s147_s0, 128, %s15_s7, [#allocation3]  }
  0x11   :  { %105 = dma.done.wait [#allocation3], 128  }
  0x12   :  { %106 = vsyncadd [#allocation3], 4294967168  ;;  %v22_v0 = vlaneseq  ;;  %v21_v2 = vld [vmem:[#allocation2] sm:$0xff]  ;;  %s110_s18 = smov [#allocation5]  }
  0x13   :  { %vm25_vm1 = vcmp.gt.f32.partialorder %v21_v2, 2.0  ;;  %vm26_vm2 = vcmp.lt.f32.partialorder %v21_v2, 0.0  ;;  %vm31_vm3 = vcmp.gt.f32.partialorder %v21_v2, 4.0  ;;  %vm32_vm4 = vcmp.lt.f32.partialorder %v21_v2, 2.0  ;;  %s44_s19 = sshll.u32 %s110_s18, 4  ;;  %s45_s19 = int_to_ptr.vmem [resolvable:$true] %s44_s19 }
  0x14   :  { %v23_v1 = vshrl.u32 %v22_v0, 7  ;;  %vm27_vm5 = vmor %vm25_vm1, %vm26_vm2  ;;  %s83_s0 = scalar_lea.vmem %s45_s19, 256  ;;  %p88_p9 = scmp.lt.s32.totalorder %s45_s19, %s45_s19 }
  0x15   :  { %v28_v3 = vsel %vm27_vm5, -1.0, %v21_v2  ;;  %vm33_vm6 = vmor %vm31_vm3, %vm32_vm4  ;;  %p84_p8 = scmp.ne.s32.totalorder %s45_s19, %s83_s0  ;;  %p89_p10 = scmp.lt.s32.totalorder %s83_s0, %s83_s0 }
  0x16   :  { %vm24_vm0 = vcmp.eq.s32.totalorder %v23_v1, 0  ;;  %v34_v5 = vsel %vm33_vm6, -1.0, %v21_v2 }
  0x17   :  { %v29_v4 = vsel %vm24_vm0, %v28_v3, %v21_v2  ;;  %v56_v6 = vadd.f32 -2.0, %v34_v5  ;;  %p90_p11 = por %p89_p10, %p88_p9 }
  0x18   :  { %30 = vst [vmem:[#allocation5] sm:$0xff] %v29_v4 }
  0x19   :  { %v36_v7 = vsel %vm24_vm0, %v56_v6, %v21_v2  ;;  %p91_p12 = pnand %p90_p11, %p84_p8 }
  0x1a   :  { %38 = vst [vmem:[#allocation5 + $0x8] sm:$0xff] %v36_v7 }
  0x1b   :  { %94 = shalt.err (!%p91_p12)
}
  0x1c   :  { %s95_s22 = scalar_lea.hbm %s148_s1, 256 }
  0x1d   :  { %p96_p13 = scmp.ne.s32.totalorder %s148_s1, %s95_s22  ;;  %p99_p0 = scmp.lt.u32.totalorder %s95_s22, %s148_s1 }
  0x1f   :  { %p101_p1 = pnand %p99_p0, %p96_p13 }
  0x21   :  { %104 = shalt.err (!%p101_p1)
}
  0x22   :  { %s111_s27 = smov 128   ;;  %s112_s28 = smov 8  }
  0x23   :  { %50 = dma.vmem_to_hbm [thread:$0]  %s45_s19, 256, %s148_s1, [#allocation4], %s111_s27, %s111_s27, %s112_s28  }
  0x24   :  { %107 = dma.done.wait [#allocation4], 256  }
  0x25   :  { %108 = vsyncadd [#allocation4], 4294967040 }
  0x26   :  { %54 = vsyncpa [#allocation3], 1 }
  0x27   :  { %55 = vsyncpa [#allocation4], 1 }

</bundles_post_ra>
